<compile_context>
chip_gen: v7x
topology: tpu7x:2x2x1
jax: 0.10.0
libtpu: 0.0.40
codegen_flags: <defaults>
</compile_context>

<pallas_src>
import jax
import jax.numpy as jnp
from jax.experimental import pallas as pl
from jax.experimental.pallas import tpu as pltpu

LANES = 1024              # lane-dense last dim (multiple of 128)
MAX_BLOCK_ROWS = 512      # (512, 1024) f32 tile = 2 MiB per array
MIN_ROWS_FOR_SPLIT = 16   # below this a 2-way (megacore) split cannot help
SMALL_N = LANES           # <= this many elements -> plain jnp, no kernel launch


def _expr(x, y, c_float, rational, c_int):
    """The expression tree, shared by kernel / reference / tiny-input bypass.

    memodict semantics: the shared Symbol subexpressions x, y are evaluated
    (loaded) exactly once and reused by every consumer below.
    """
    pow_x2 = x * x                    # Pow(x, Integer(2))
    term_a = c_float * pow_x2         # Mul(Float(3.0), Pow(x, 2))
    term_b = x * y                    # Mul(x, y)
    term_c = jnp.sin(x)               # sin(x)                      (VPU/EUP)
    term_d = rational * jnp.exp(y)    # Mul(Rational(1,2), exp(y))  (EUP)
    return term_a + term_b + term_c + term_d + c_int   # top-level Add


def _node_kernel(consts_ref, x_ref, y_ref, o_ref):
    # consts_ref: SMEM f32[3] = [Float(3.0) param, Rational p/q, Integer(2)]
    x = x_ref[...].astype(jnp.float32)     # upcast in VMEM (free on VPU)
    y = y_ref[...].astype(jnp.float32)
    c_float = consts_ref[0]
    rational = consts_ref[1]
    c_int = consts_ref[2]
    o_ref[...] = _expr(x, y, c_float, rational, c_int).astype(o_ref.dtype)


def node_forward(x, y, consts):
    """Evaluate the expression tree elementwise on x, y (same shape)."""
    assert x.shape == y.shape
    orig_shape = x.shape
    out_dtype = x.dtype   # torch with f32 params would promote to f32; we keep
                          # the caller's dtype to avoid doubling output traffic.

    # Runtime scalars of the module: Float parameter, Rational buffers (divide
    # hoisted out of the per-grid-step kernel body), Integer constant.
    consts_k = jnp.stack(
        [consts[0], consts[1] / consts[2], consts[3]]).astype(jnp.float32)

    n = x.size
    if n <= SMALL_N:
        # Tiny input: a pallas_call's launch + DMA prologue dwarfs streaming a
        # few KiB; let XLA fuse the elementwise chain instead.
        res = _expr(x.astype(jnp.float32), y.astype(jnp.float32),
                    consts_k[0], consts_k[1], consts_k[2])
        return res.astype(out_dtype).reshape(orig_shape)

    xf = x.reshape(-1)
    yf = y.reshape(-1)

    rem = n % LANES
    if rem:
        # Only the sub-LANES tail is padded (zero-pad: sin(0)=0, exp(0)=1, no
        # NaN/Inf).  See TODO(synk) at top about the copy this still implies.
        pad = LANES - rem
        xf = jnp.pad(xf, (0, pad))
        yf = jnp.pad(yf, (0, pad))

    rows = xf.size // LANES
    x2d = xf.reshape(rows, LANES)   # free bitcast reshape (contiguous)
    y2d = yf.reshape(rows, LANES)

    if rows < MIN_ROWS_FOR_SPLIT:
        block_rows = rows           # single block == full dim (always legal)
    else:
        # Target <= 2 MiB/array tiles and >= 2 grid steps so both v7x
        # TensorCores get a share; negligible cost on 1-TC v5e/v6e.
        block_rows = min(MAX_BLOCK_ROWS, ((pl.cdiv(rows, 2) + 7) // 8) * 8)
    grid_steps = pl.cdiv(rows, block_rows)   # ragged last row-block is fine:
                                             # OOB reads unused, OOB writes dropped.

    itemsize = jnp.dtype(x.dtype).itemsize
    cost = pl.CostEstimate(
        flops=9 * n,
        transcendentals=2 * n,
        bytes_accessed=(2 * itemsize + jnp.dtype(out_dtype).itemsize) * n,
    )

    out2d = pl.pallas_call(
        _node_kernel,
        out_shape=jax.ShapeDtypeStruct((rows, LANES), out_dtype),
        grid=(grid_steps,),
        in_specs=[
            pl.BlockSpec(memory_space=pltpu.MemorySpace.SMEM),      # consts
            pl.BlockSpec((block_rows, LANES), lambda i: (i, 0)),    # x
            pl.BlockSpec((block_rows, LANES), lambda i: (i, 0)),    # y
        ],
        out_specs=pl.BlockSpec((block_rows, LANES), lambda i: (i, 0)),
        compiler_params=pltpu.CompilerParams(
            dimension_semantics=("parallel",),
            vmem_limit_bytes=32 * 1024 * 1024,   # <= 12 MiB used; safe everywhere
        ),
        cost_estimate=cost,
    )(consts_k, x2d, y2d)

    flat = out2d.reshape(-1)
    if rem:
        flat = flat[:n]
    return flat.reshape(orig_shape)


def node_forward_ref(x, y, consts):
    """Pure-JAX reference of the same expression tree."""
    xf = x.astype(jnp.float32)
    yf = y.astype(jnp.float32)
    return _expr(xf, yf, consts[0], consts[1] / consts[2], consts[3])


if __name__ == "__main__":
    key = jax.random.PRNGKey(0)
    kx, ky, kx2, ky2, kx3, ky3 = jax.random.split(key, 6)

    # Deterministic "parameters"/buffers of the _Node tree:
    #   Float(3.0) parameter, Rational(1, 2) buffers, Integer(2) constant.
    consts = jnp.array([3.0, 1.0, 2.0, 2.0], dtype=jnp.float32)

    # NCHW tensors bound to Symbols 'x' and 'y' in the torch memodict.
    # 2*4*16*16 = 2048 = 2 full 1024-lane rows -> zero-pad / zero-slice path.
    x = jax.random.normal(kx, (2, 4, 16, 16), dtype=jnp.float32)
    y = jax.random.normal(ky, (2, 4, 16, 16), dtype=jnp.float32)
    out = jax.block_until_ready(node_forward(x, y, consts))
    ref = node_forward_ref(x, y, consts)
    assert out.shape == x.shape and out.dtype == x.dtype
    assert jnp.allclose(out, ref, atol=1e-5, rtol=1e-5)

    # Ragged size (3*5*7*11 = 1155): exercises the sub-LANES tail-pad path.
    x2 = jax.random.normal(kx2, (3, 5, 7, 11), dtype=jnp.float32)
    y2 = jax.random.normal(ky2, (3, 5, 7, 11), dtype=jnp.float32)
    out2 = jax.block_until_ready(node_forward(x2, y2, consts))
    assert out2.shape == x2.shape
    assert jnp.allclose(out2, node_forward_ref(x2, y2, consts),
                        atol=1e-5, rtol=1e-5)

    # Larger aligned size (8*128*128 = 131072 -> 128 rows): exercises the
    # 2-step "parallel" grid split used to feed both v7x TensorCores.
    x3 = jax.random.normal(kx3, (8, 128, 128), dtype=jnp.float32)
    y3 = jax.random.normal(ky3, (8, 128, 128), dtype=jnp.float32)
    out3 = jax.block_until_ready(node_forward(x3, y3, consts))
    assert jnp.allclose(out3, node_forward_ref(x3, y3, consts),
                        atol=1e-5, rtol=1e-5)

    print("KERNEL_OK")
</pallas_src>

<mosaic_0001>
module attributes {stable_mosaic.version = 11 : i64} {
  func.func @_node_kernel(%arg0: i32, %arg1: memref<3xf32, #tpu.memory_space<smem>>, %arg2: memref<2x1024xf32, #tpu.memory_space<vmem>>, %arg3: memref<2x1024xf32, #tpu.memory_space<vmem>>, %arg4: memref<2x1024xf32, #tpu.memory_space<vmem>>) attributes {dimension_semantics = [#tpu.dimension_semantics<parallel>], iteration_bounds = array<i64: 1>, scalar_prefetch = 0 : i64, scratch_operands = 0 : i64, tpu.core_type = #tpu.core_type<tc>, window_params = [{transform_indices = @transform_0, window_bounds = array<i64: 3>}, {transform_indices = @transform_1, window_bounds = array<i64: 2, 1024>}, {transform_indices = @transform_2, window_bounds = array<i64: 2, 1024>}, {transform_indices = @transform_3, window_bounds = array<i64: 2, 1024>}]} {
    %c0 = arith.constant 0 : index
    %c0_0 = arith.constant 0 : index
    %0 = vector.load %arg2[%c0, %c0_0] : memref<2x1024xf32, #tpu.memory_space<vmem>>, vector<2x1024xf32>
    %c0_1 = arith.constant 0 : index
    %c0_2 = arith.constant 0 : index
    %1 = vector.load %arg3[%c0_1, %c0_2] : memref<2x1024xf32, #tpu.memory_space<vmem>>, vector<2x1024xf32>
    %c0_3 = arith.constant 0 : index
    %2 = memref.load %arg1[%c0_3] : memref<3xf32, #tpu.memory_space<smem>>
    %c1 = arith.constant 1 : index
    %3 = memref.load %arg1[%c1] : memref<3xf32, #tpu.memory_space<smem>>
    %c2 = arith.constant 2 : index
    %4 = memref.load %arg1[%c2] : memref<3xf32, #tpu.memory_space<smem>>
    %5 = arith.mulf %0, %0 : vector<2x1024xf32>
    %6 = vector.broadcast %2 : f32 to vector<2x1024xf32>
    %7 = arith.mulf %6, %5 : vector<2x1024xf32>
    %8 = arith.mulf %0, %1 : vector<2x1024xf32>
    %9 = math.sin %0 : vector<2x1024xf32>
    %10 = math.exp %1 : vector<2x1024xf32>
    %11 = vector.broadcast %3 : f32 to vector<2x1024xf32>
    %12 = arith.mulf %11, %10 : vector<2x1024xf32>
    %13 = arith.addf %7, %8 : vector<2x1024xf32>
    %14 = arith.addf %13, %9 : vector<2x1024xf32>
    %15 = arith.addf %14, %12 : vector<2x1024xf32>
    %16 = vector.broadcast %4 : f32 to vector<2x1024xf32>
    %17 = arith.addf %15, %16 : vector<2x1024xf32>
    %c0_4 = arith.constant 0 : index
    %c0_5 = arith.constant 0 : index
    %18 = vector.load %arg4[%c0_4, %c0_5] : memref<2x1024xf32, #tpu.memory_space<vmem>>, vector<2x1024xf32>
    tpu.vector_store %arg4[%c0_4, %c0_5], %17 {strides = array<i32>} : memref<2x1024xf32, #tpu.memory_space<vmem>>, vector<2x1024xf32>,
    return
  }
  func.func @transform_0(%arg0: i32) -> i32 {
    %c0_i32 = arith.constant 0 : i32
    %c0_i32_0 = arith.constant 0 : i32
    return %c0_i32 : i32
  }
  func.func @transform_1(%arg0: i32) -> (i32, i32) {
    %c0_i32 = arith.constant 0 : i32
    %c0_i32_0 = arith.constant 0 : i32
    return %arg0, %c0_i32 : i32, i32
  }
  func.func @transform_2(%arg0: i32) -> (i32, i32) {
    %c0_i32 = arith.constant 0 : i32
    %c0_i32_0 = arith.constant 0 : i32
    return %arg0, %c0_i32 : i32, i32
  }
  func.func @transform_3(%arg0: i32) -> (i32, i32) {
    %c0_i32 = arith.constant 0 : i32
    %c0_i32_0 = arith.constant 0 : i32
    return %arg0, %c0_i32 : i32, i32
  }
}

</mosaic_0001>

<bundles_post_ra>
// kernel: tpu_custom_call.1
= control target key start
LH: loop header
LB: loop body
LE: loop exit
PB: predicated region body
PF: predicated region fallthrough
CT: control target
= control target key end

     0   :  { %8 = vsyncpa [#allocation5], 0  ;;  %s601_s0 = inlined_call_operand.hbm [shape: f32[3], index: 0, kind: input, shape index: {}]   ;;  %s602_s1 = inlined_call_operand.hbm [shape: f32[2,1024], index: 1, kind: input, shape index: {}]   ;;  %s603_s2 = inlined_call_operand.hbm [shape: f32[2,1024], index: 2, kind: input, shape index: {}]   ;;  %s604_s3 = inlined_call_operand.hbm [shape: f32[2,1024], index: 3, kind: output, shape index: {}]  }
   0x1   :  { %9 = vsyncpa [#allocation3], 0 }
   0x2   :  { %10 = vsyncpa [#allocation8], 0 }
   0x3   :  { %11 = vsyncpa [#allocation4], 0  ;;  %s347_s14 = scalar_lea.hbm %s601_s0, 16 }
   0x4   :  { %p348_p0 = scmp.ne.s32.totalorder %s601_s0, %s347_s14  ;;  %p351_p1 = scmp.lt.u32.totalorder %s347_s14, %s601_s0 }
   0x6   :  { %p353_p2 = pnand %p351_p1, %p348_p0 }
   0x8   :  { %356 = shalt.err (!%p353_p2)
}
   0x9   :  { %s431_s19 = smov [#allocation2]   ;;  %s432_s22 = smov [#allocation6]  }
   0xa   :  { %19 = dma.hbm_to_smem %s601_s0, 16, %s431_s19, [#allocation5]  }
   0xb   :  { %s26_s23 = sshll.u32 %s432_s22, 4  ;;  %s433_s24 = smov [#allocation7]   ;;  %s27_s23 = int_to_ptr.vmem [resolvable:$true] %s26_s23 }
   0xc   :  { %s36_s25 = sshll.u32 %s433_s24, 4  ;;  %s357_s28 = scalar_lea.hbm %s602_s1, 256  ;;  %s37_s25 = int_to_ptr.vmem [resolvable:$true] %s36_s25 }
   0xd   :  { %p358_p3 = scmp.ne.s32.totalorder %s602_s1, %s357_s28  ;;  %p361_p4 = scmp.lt.u32.totalorder %s357_s28, %s602_s1 }
   0xf   :  { %p363_p5 = pnand %p361_p4, %p358_p3 }
  0x11   :  { %366 = shalt.err (!%p363_p5)
}
  0x12   :  { %s367_s0 = scalar_lea.vmem %s27_s23, 256  ;;  %p372_p7 = scmp.lt.s32.totalorder %s27_s23, %s27_s23 }
  0x13   :  { %p368_p6 = scmp.ne.s32.totalorder %s27_s23, %s367_s0  ;;  %p373_p8 = scmp.lt.s32.totalorder %s367_s0, %s367_s0 }
  0x15   :  { %p374_p9 = por %p373_p8, %p372_p7 }
  0x17   :  { %p375_p10 = pnand %p374_p9, %p368_p6 }
  0x19   :  { %378 = shalt.err (!%p375_p10)
}
  0x1a   :  { %29 = dma.hbm_to_vmem [thread:$0]  %s602_s1, 256, %s27_s23, [#allocation3]  }
  0x1b   :  { %s379_s10 = scalar_lea.hbm %s603_s2, 256 }
  0x1c   :  { %p380_p11 = scmp.ne.s32.totalorder %s603_s2, %s379_s10  ;;  %p383_p12 = scmp.lt.u32.totalorder %s379_s10, %s603_s2 }
  0x1e   :  { %p385_p13 = pnand %p383_p12, %p380_p11 }
  0x20   :  { %388 = shalt.err (!%p385_p13)
}
  0x21   :  { %s389_s15 = scalar_lea.vmem %s37_s25, 256  ;;  %p394_p1 = scmp.lt.s32.totalorder %s37_s25, %s37_s25 }
  0x22   :  { %p390_p0 = scmp.ne.s32.totalorder %s37_s25, %s389_s15  ;;  %p395_p2 = scmp.lt.s32.totalorder %s389_s15, %s389_s15 }
  0x24   :  { %p396_p3 = por %p395_p2, %p394_p1 }
  0x26   :  { %p397_p4 = pnand %p396_p3, %p390_p0 }
  0x28   :  { %400 = shalt.err (!%p397_p4)
}
  0x29   :  { %39 = dma.hbm_to_vmem [thread:$0]  %s603_s2, 256, %s37_s25, [#allocation8]  }
  0x2a   :  { %423 = dma.done.wait [#allocation5], 16  }
  0x2b   :  { %424 = vsyncadd [#allocation5], 4294967280 }
  0x2c   :  { %425 = dma.done.wait [#allocation3], 256  }
  0x2d   :  { %426 = vsyncadd [#allocation3], 4294967040 }
  0x2e   :  { %427 = dma.done.wait [#allocation8], 256  }
  0x2f   :  { %428 = vsyncadd [#allocation8], 4294967040 }
  0x30   :  { %49 = sfence }
  0x31   :  { %v497_v0 = vld [vmem:[#allocation6] sm:$0xff]  ;;  %v501_v3 = vld [vmem:[#allocation6 + $0x8] sm:$0xff]  ;;  %v434_v20 = vmov 683565275   ;;  %v435_v22 = vmov 2475754826  }
  0x32   :  { %v64_v1 = vand.u32 2147483647, %v497_v0  ;;  %v67_v2 = vand.u32 2139095040, %v497_v0  ;;  %v171_v7 = vand.u32 2139095040, %v501_v3  ;;  %v168_v8 = vand.u32 2147483647, %v501_v3 }
  0x33   :  { %v436_v24 = vmov 2131351028   ;;  %v437_v26 = vmov 2102212464   ;;  %v438_v28 = vmov 920167782  }
  0x34   :  { %v68_v4 = vshrl.u32 %v67_v2, 23  ;;  %v71_v5 = vand.u32 8388607, %v64_v1  ;;  %v172_v10 = vshrl.u32 %v171_v7, 23  ;;  %v175_v14 = vand.u32 8388607, %v168_v8 }
  0x35   :  { %v439_v36 = vmov 1326507024   ;;  %vm66_vm14 = vcmp.lt.s32.totalorder %v497_v0, 0  ;;  %vm549_vm15 = vcmp.le.f32.partialorder %v64_v1, 0.7853982  ;;  %s553_s2 = sld [smem:[#allocation2]] }
  0x36   :  { %v309_v6 = vadd.s32 4294967169, %v68_v4  ;;  %v72_v11 = vor.u32 8388608, %v71_v5  ;;  %v313_v12 = vadd.s32 4294967169, %v172_v10  ;;  %v176_v30 = vor.u32 8388608, %v175_v14  ;;  %s560_s17 = sld [smem:[#allocation2 + $0x1]]  ;;  %s573_s18 = sld [smem:[#allocation2 + $0x2]] }
  0x37   :  { %s440_s19 = smov [#allocation9]  }
  0x38   :  { %v74_v9 = vadd.s32 1, %v309_v6  ;;  %v509_v17 = vshll.u32 %v72_v11, 8  ;;  %v178_v18 = vadd.s32 1, %v313_v12  ;;  %v216_v58 = vshll.u32 %v176_v30, 8  ;;  %s296_s20 = sshll.u32 %s440_s19, 4  ;;  %s297_s20 = int_to_ptr.vmem [resolvable:$true] %s296_s20 }
  0x39   :  { %s401_s21 = scalar_lea.vmem %s297_s20, 256  ;;  %p406_p6 = scmp.lt.s32.totalorder %s297_s20, %s297_s20 }
  0x3a   :  { %vm75_vm0 = vcmp.gt.s32.totalorder %v74_v9, 0  ;;  %vm179_vm4 = vcmp.gt.s32.totalorder %v178_v18, 0  ;;  %p402_p5 = scmp.ne.s32.totalorder %s297_s20, %s401_s21  ;;  %p407_p7 = scmp.lt.s32.totalorder %s401_s21, %s401_s21 }
  0x3b   :  { %v76_v13 = vsel %vm75_vm0, %v74_v9, 0  ;;  %v180_v43 = vsel %vm179_vm4, %v178_v18, 0  ;;  %vm170_vm0 = vcmp.lt.s32.totalorder %v501_v3, 0 }
  0x3c   :  { %v77_v15 = vshrl.u32 %v76_v13, 5  ;;  %v78_v16 = vand.u32 31, %v76_v13  ;;  %v181_v53 = vshrl.u32 %v180_v43, 5  ;;  %v182_v54 = vand.u32 31, %v180_v43  ;;  %p408_p8 = por %p407_p7, %p406_p6 }
  0x3e   :  { %v79_v19 = vsub.s32 32, %v78_v16  ;;  %v81_v21 = vshll.u32 %v434_v20, %v78_v16  ;;  %v84_v23 = vshll.u32 %v435_v22, %v78_v16  ;;  %v87_v25 = vshll.u32 %v436_v24, %v78_v16  ;;  %p409_p9 = pnand %p408_p8, %p402_p5 }
  0x3f   :  { %v90_v27 = vshll.u32 %v437_v26, %v78_v16  ;;  %v93_v29 = vshll.u32 %v438_v28, %v78_v16  ;;  %vm96_vm1 = vcmp.lt.s32.totalorder %v77_v15, 1  ;;  %vm97_vm2 = vcmp.lt.s32.totalorder %v77_v15, 2 }
  0x40   :  { %v80_v31 = vshrl.u32 %v434_v20, %v79_v19  ;;  %v82_v32 = vshrl.u32 %v435_v22, %v79_v19  ;;  %v85_v33 = vshrl.u32 %v436_v24, %v79_v19  ;;  %v88_v34 = vshrl.u32 %v437_v26, %v79_v19 }
  0x41   :  { %v91_v35 = vshrl.u32 %v438_v28, %v79_v19  ;;  %v94_v37 = vshrl.u32 %v439_v36, %v79_v19  ;;  %vm99_vm3 = vcmp.lt.s32.totalorder %v77_v15, 4  ;;  %vm98_vm5 = vcmp.lt.s32.totalorder %v77_v15, 3 }
  0x42   :  { %v83_v38 = vor.u32 %v82_v32, %v81_v21  ;;  %v86_v39 = vor.u32 %v85_v33, %v84_v23  ;;  %v89_v40 = vor.u32 %v88_v34, %v87_v25  ;;  %v183_v63 = vsub.s32 32, %v182_v54 }
  0x43   :  { %v92_v41 = vor.u32 %v91_v35, %v90_v27  ;;  %v95_v42 = vor.u32 %v94_v37, %v93_v29  ;;  %v185_v2 = vshll.u32 %v434_v20, %v182_v54  ;;  %v188_v4 = vshll.u32 %v435_v22, %v182_v54 }
  0x44   :  { %v100_v44 = vsel %vm96_vm1, %v80_v31, %v83_v38  ;;  %v101_v45 = vsel %vm99_vm3, %v89_v40, 2102212464  ;;  %v104_v46 = vsel %vm96_vm1, %v83_v38, %v86_v39  ;;  %v108_v47 = vsel %vm96_vm1, %v86_v39, %v89_v40 }
  0x45   :  { %v102_v48 = vsel %vm98_vm5, %v86_v39, %v101_v45  ;;  %v105_v49 = vsel %vm99_vm3, %v92_v41, 920167782  ;;  %v109_v50 = vsel %vm99_vm3, %v95_v42, 1326507024  ;;  %v191_v5 = vshll.u32 %v436_v24, %v182_v54 }
  0x46   :  { %v106_v51 = vsel %vm98_vm5, %v89_v40, %v105_v49  ;;  %v110_v52 = vsel %vm98_vm5, %v92_v41, %v109_v50  ;;  %v103_v55 = vsel %vm97_vm2, %v100_v44, %v102_v48  ;;  %v194_v7 = vshll.u32 %v437_v26, %v182_v54 }
  0x47   :  { %v107_v56 = vsel %vm97_vm2, %v104_v46, %v106_v51  ;;  %v111_v57 = vsel %vm97_vm2, %v108_v47, %v110_v52  ;;  %v119_v6 = vmul.u32 %v509_v17, %v103_v55  ;;  %v197_v9 = vshll.u32 %v438_v28, %v182_v54 }
  0x48   :  { %v518_v59 = vmul.u32.u64.low %v509_v17, %v111_v57  ;;  %v519_v60 = vmul.u32.u64.high %v509_v17, %v111_v57, %v518_v59  ;;  %v522_v61 = vmul.u32.u64.low %v509_v17, %v107_v56  ;;  %v523_v62 = vmul.u32.u64.high %v509_v17, %v107_v56, %v522_v61 }
  0x49   :  { %vm200_vm6 = vcmp.lt.s32.totalorder %v181_v53, 1  ;;  %v184_v10 = vshrl.u32 %v434_v20, %v183_v63  ;;  %v186_v11 = vshrl.u32 %v435_v22, %v183_v63  ;;  %v189_v12 = vshrl.u32 %v436_v24, %v183_v63 }
  0x4a   :  { %v192_v13 = vshrl.u32 %v437_v26, %v183_v63  ;;  %vm121_vm7 = vc.u32 %v519_v60, %v522_v61  ;;  %v122_v14 = vadd.s32 1, %v523_v62  ;;  %v195_v15 = vshrl.u32 %v438_v28, %v183_v63 }
  0x4b   :  { %vm201_vm8 = vcmp.lt.s32.totalorder %v181_v53, 2  ;;  %v187_v16 = vor.u32 %v186_v11, %v185_v2  ;;  %v190_v18 = vor.u32 %v189_v12, %v188_v4  ;;  %v198_v21 = vshrl.u32 %v439_v36, %v183_v63 }
  0x4c   :  { %v193_v19 = vor.u32 %v192_v13, %v191_v5  ;;  %v123_v23 = vsel %vm121_vm7, %v122_v14, %v523_v62  ;;  %v196_v17 = vor.u32 %v195_v15, %v194_v7  ;;  %vm202_vm9 = vcmp.lt.s32.totalorder %v181_v53, 3 }
  0x4d   :  { %vm203_vm10 = vcmp.lt.s32.totalorder %v181_v53, 4  ;;  %v124_v25 = vadd.s32 %v123_v23, %v119_v6  ;;  %v199_v20 = vor.u32 %v198_v21, %v197_v9  ;;  %v204_v22 = vsel %vm200_vm6, %v184_v10, %v187_v16 }
  0x4e   :  { %v205_v24 = vsel %vm203_vm10, %v193_v19, 2102212464  ;;  %v208_v27 = vsel %vm200_vm6, %v187_v16, %v190_v18  ;;  %v209_v29 = vsel %vm203_vm10, %v196_v17, 920167782  ;;  %v212_v28 = vsel %vm200_vm6, %v190_v18, %v193_v19  ;;  %v52_v16 = vld [vmem:[#allocation7] sm:$0xff] }
  0x4f   :  { %v206_v26 = vsel %vm202_vm9, %v190_v18, %v205_v24  ;;  %v125_v30 = vadd.s32 536870912, %v124_v25  ;;  %v210_v31 = vsel %vm202_vm9, %v193_v19, %v209_v29  ;;  %v213_v32 = vsel %vm203_vm10, %v199_v20, 1326507024 }
  0x50   :  { %v207_v33 = vsel %vm201_vm8, %v204_v22, %v206_v26  ;;  %v211_v34 = vsel %vm201_vm8, %v208_v27, %v210_v31  ;;  %v214_v35 = vsel %vm202_vm9, %v196_v17, %v213_v32  ;;  %v120_v55 = vadd.s32 %v522_v61, %v519_v60 }
  0x51   :  { %v126_v36 = vshrl.u32 %v125_v30, 30  ;;  %v215_v37 = vsel %vm201_vm8, %v212_v28, %v214_v35  ;;  %v535_v38 = vmul.u32.u64.low %v216_v58, %v211_v34  ;;  %v536_v39 = vmul.u32.u64.high %v216_v58, %v211_v34, %v535_v38 }
  0x52   :  { %v538_v40 = vmul.u32.u64.low %v216_v58, %v215_v37  ;;  %v539_v41 = vmul.u32.u64.high %v216_v58, %v215_v37, %v538_v40  ;;  %v223_v43 = vmul.u32 %v216_v58, %v207_v33  ;;  %v272_v26 = vmul.f32 1.442695, %v52_v16  ;;  %v53_v37 = vld [vmem:[#allocation7 + $0x8] sm:$0xff] }
  0x53   :  { %v127_v42 = vshll.u32 %v126_v36, 30  ;;  %v226_v45 = vadd.s32 1, %v536_v39  ;;  %v150_v14 = vsub.s32 4, %v126_v36  ;;  %v57_v35 = vmul.f32 %v497_v0, %v497_v0 }
  0x54   :  { %vm225_vm11 = vc.u32 %v539_v41, %v535_v38  ;;  %v224_v60 = vadd.s32 %v535_v38, %v539_v41  ;;  %v59_v38 = vstv %s553_s2  ;;  %vm568_vm1 = vcmp.le.f32.partialorder %v168_v8, 0.7853982 }
  0x55   :  { %v128_v44 = vsub.s32 %v124_v25, %v127_v42  ;;  %v227_v47 = vsel %vm225_vm11, %v226_v45, %v536_v39  ;;  %v151_v25 = vsel %vm66_vm14, %v150_v14, %v126_v36  ;;  %vm156_vm3 = vweird.f32 %v497_v0 }
  0x56   :  { %v228_v48 = vadd.s32 %v227_v47, %v223_v43  ;;  %v153_v29 = vsel %vm549_vm15, 0, %v151_v25  ;;  %v60_v43 = vmul.f32 %v59_v38, %v57_v35  ;;  %vm260_vm9 = vweird.f32 %v501_v3 }
  0x57   :  { %v130_v46 = vsub.s32 0, %v128_v44  ;;  %v157_v32 = vadd.s32 3, %v153_v29 }
  0x58   :  { %v229_v50 = vadd.s32 536870912, %v228_v48 }
  0x59   :  { %v310_v49 = vmin.u32 %v130_v46, %v128_v44  ;;  %v158_v39 = vand.u32 3, %v157_v32  ;;  %v274_v46 = vmul.f32 1.442695, %v53_v37 }
  0x5a   :  { %v230_v52 = vshrl.u32 %v229_v50, 30 }
  0x5b   :  { %v132_v51 = vclz %v310_v49  ;;  %vm163_vm2 = vcmp.eq.s32.totalorder %v158_v39, 2  ;;  %vm160_vm4 = vcmp.eq.s32.totalorder %v158_v39, 0  ;;  %vm159_vm5 = vcmp.lt.s32.totalorder %v158_v39, 2 }
  0x5c   :  { %v231_v54 = vshll.u32 %v230_v52, 30  ;;  %v254_v34 = vsub.s32 4, %v230_v52 }
  0x5d   :  { %v311_v53 = vadd.s32 4294967294, %v132_v51 }
  0x5e   :  { %v232_v57 = vsub.s32 %v228_v48, %v231_v54  ;;  %v255_v42 = vsel %vm170_vm0, %v254_v34, %v230_v52 }
  0x5f   :  { %vm312_vm12 = vcmp.lt.s32.totalorder %v311_v53, 0  ;;  %v257_v8 = vsel %vm568_vm1, 0, %v255_v42 }
  0x60   :  { %v135_v56 = vsel %vm312_vm12, 0, %v311_v53  ;;  %v234_v63 = vsub.s32 0, %v232_v57  ;;  %v276_v53 = vstv %s560_s17 }
  0x61   :  { %v136_v58 = vsub.s32 32, %v135_v56  ;;  %v137_v59 = vshll.u32 %v128_v44, %v135_v56  ;;  %v140_v62 = vsub.s32 4294967266, %v135_v56  ;;  %v62_v44 = vmul.f32 %v52_v16, %v497_v0 }
  0x62   :  { %v314_v5 = vmin.u32 %v234_v63, %v232_v57 }
  0x63   :  { %v138_v2 = vshrl.u32 %v120_v55, %v136_v58  ;;  %v141_v4 = vadd.s32 127, %v140_v62  ;;  %v261_v55 = vadd.s32 3, %v257_v8  ;;  %v279_v56 = vadd.f32 %v62_v44, %v60_v43 }
  0x64   :  { %v236_v9 = vclz %v314_v5  ;;  %v58_v62 = vmul.f32 %v501_v3, %v501_v3  ;;  %v285_v5 = vstv %s573_s18 }
  0x65   :  { %v139_v6 = vor.u32 %v138_v2, %v137_v59  ;;  %v142_v7 = vshll.u32 %v141_v4, 23  ;;  %v262_v2 = vand.u32 3, %v261_v55 }
  0x66   :  { %v315_v12 = vadd.s32 4294967294, %v236_v9  ;;  %v63_v9 = vmul.f32 %v53_v37, %v501_v3 }
  0x67   :  { %v143_v10 = vor.u32 4788187, %v142_v7  ;;  %v146_v11 = vcvt.s32.f32 %v139_v6  ;;  %v61_v7 = vmul.f32 %v59_v38, %v58_v62  ;;  %vm267_vm6 = vcmp.eq.s32.totalorder %v262_v2, 2 }
  0x68   :  { %vm316_vm13 = vcmp.lt.s32.totalorder %v315_v12, 0  ;;  %vm264_vm7 = vcmp.eq.s32.totalorder %v262_v2, 0  ;;  %vm263_vm8 = vcmp.lt.s32.totalorder %v262_v2, 2 }
  0x69   :  { %v144_v13 = vand.u32 2147483647, %v143_v10  ;;  %v239_v15 = vsel %vm316_vm13, 0, %v315_v12 }
  0x6a   :  { %v240_v18 = vsub.s32 32, %v239_v15  ;;  %v241_v19 = vshll.u32 %v232_v57, %v239_v15  ;;  %v244_v21 = vsub.s32 4294967266, %v239_v15 }
  0x6b   :  { %v147_v61 = vmul.f32 %v146_v11, %v144_v13 }
  0x6c   :  { %v242_v20 = vshrl.u32 %v224_v60, %v240_v18  ;;  %v245_v22 = vadd.s32 127, %v244_v21 }
  0x6d   :  { %v148_v17 = vxor.u32 2147483648, %v147_v61 }
  0x6e   :  { %v243_v1 = vor.u32 %v242_v20, %v241_v19  ;;  %v246_v28 = vshll.u32 %v245_v22, 23 }
  0x6f   :  { %v149_v24 = vsel %vm66_vm14, %v148_v17, %v147_v61  ;;  %v280_v61 = vadd.f32 %v63_v9, %v61_v7 }
  0x70   :  { %v152_v27 = vsel %vm549_vm15, %v497_v0, %v149_v24  ;;  %v247_v30 = vor.u32 4788187, %v246_v28  ;;  %v250_v31 = vcvt.s32.f32 %v243_v1 }
  0x71   :  { %335 = vcosq.f32 %v152_v27 }
  0x72   :  { %337 = vsinq.f32 %v152_v27  ;;  %v248_v33 = vand.u32 2147483647, %v247_v30 }
  0x73   :  { %339 = vpow2.f32 %v272_v26 }
  0x74   :  { %v251_v36 = vmul.f32 %v250_v31, %v248_v33 }
  0x76   :  { %v252_v41 = vxor.u32 2147483648, %v251_v36 }
  0x78   :  { %v253_v45 = vsel %vm170_vm0, %v252_v41, %v251_v36 }
  0x79   :  { %v256_v48 = vsel %vm568_vm1, %v501_v3, %v253_v45 }
  0x7a   :  { %341 = vcosq.f32 %v256_v48 }
  0x7b   :  { %v336_v47 = vpop.eup %335  ;;  %343 = vsinq.f32 %v256_v48 }
  0x7c   :  { %v338_v49 = vpop.eup %337  ;;  %v164_v50 = vxor.u32 2147483648, %v336_v47  ;;  %345 = vpow2.f32 %v274_v46 }
  0x7d   :  { %v340_v51 = vpop.eup %339  ;;  %v161_v52 = vxor.u32 2147483648, %v338_v49 }
  0x7e   :  { %v165_v54 = vsel %vm163_vm2, %v164_v50, %v338_v49  ;;  %v277_v59 = vmul.f32 %v340_v51, %v276_v53 }
  0x7f   :  { %v162_v57 = vsel %vm160_vm4, %v336_v47, %v161_v52 }
  0x80   :  { %v166_v58 = vsel %vm159_vm5, %v162_v57, %v165_v54 }
  0x81   :  { %v167_v63 = vsel %vm156_vm3, nan, %v166_v58 }
  0x82   :  { %v281_v4 = vadd.f32 %v279_v56, %v167_v63 }
  0x84   :  { %v283_v6 = vadd.f32 %v281_v4, %v277_v59  ;;  %v342_v10 = vpop.eup %341 }
  0x85   :  { %v344_v12 = vpop.eup %343  ;;  %v268_v13 = vxor.u32 2147483648, %v342_v10 }
  0x86   :  { %v286_v11 = vadd.f32 %v285_v5, %v283_v6  ;;  %v346_v14 = vpop.eup %345  ;;  %v265_v60 = vxor.u32 2147483648, %v344_v12 }
  0x87   :  { %v269_v0 = vsel %vm267_vm6, %v268_v13, %v344_v12  ;;  %v278_v18 = vmul.f32 %v346_v14, %v276_v53 }
  0x88   :  { %288 = vst [vmem:[#allocation9] sm:$0xff] %v286_v11  ;;  %v266_v15 = vsel %vm264_vm7, %v342_v10, %v265_v60 }
  0x89   :  { %v270_v16 = vsel %vm263_vm8, %v266_v15, %v269_v0 }
  0x8a   :  { %v271_v19 = vsel %vm260_vm9, nan, %v270_v16 }
  0x8b   :  { %v282_v21 = vadd.f32 %v280_v61, %v271_v19 }
  0x8d   :  { %v284_v23 = vadd.f32 %v282_v21, %v278_v18 }
  0x8f   :  { %v287_v17 = vadd.f32 %v285_v5, %v284_v23 }
  0x91   :  { %289 = vst [vmem:[#allocation9 + $0x8] sm:$0xff] %v287_v17 }
  0x92   :  { %412 = shalt.err (!%p409_p9)
}
  0x93   :  { %s413_s24 = scalar_lea.hbm %s604_s3, 256 }
  0x94   :  { %p414_p10 = scmp.ne.s32.totalorder %s604_s3, %s413_s24  ;;  %p417_p11 = scmp.lt.u32.totalorder %s413_s24, %s604_s3 }
  0x96   :  { %p419_p12 = pnand %p417_p11, %p414_p10 }
  0x98   :  { %422 = shalt.err (!%p419_p12)
}
  0x99   :  { %299 = dma.vmem_to_hbm [thread:$0]  %s297_s20, 256, %s604_s3, [#allocation4]  }
  0x9a   :  { %429 = dma.done.wait [#allocation4], 256  }
  0x9b   :  { %430 = vsyncadd [#allocation4], 4294967040 }
  0x9c   :  { %303 = vsyncpa [#allocation3], 1 }
  0x9d   :  { %304 = vsyncpa [#allocation8], 1 }
  0x9e   :  { %305 = vsyncpa [#allocation4], 1 }
  0x9f   :  { %306 = vsyncpa [#allocation5], 1 }

</bundles_post_ra>
